<compile_context>
chip_gen: v7x
topology: tpu7x:2x2x1
jax: 0.10.0
libtpu: 0.0.40
codegen_flags: <defaults>
</compile_context>

<pallas_src>
import math

import jax
import jax.numpy as jnp
from jax.experimental import pallas as pl
from jax.experimental.pallas import tpu as pltpu


_LANE = 128                      # f32 lane width; tiles are multiples of this
_ROW_TILE_TARGET = 1024          # output-lane side: big => unmasked, lane-dense stores
_MIB = 1024 * 1024
_SMALL_VMEM = 64 * _MIB          # v7x per-TensorCore VMEM (conservative default)
_MIN_PALLAS_BYTES = 1 * _MIB     # below this, XLA's native transpose/fusion wins


def _chip_vmem_bytes():
    """Physical VMEM per core (trace-time query with a conservative fallback)."""
    try:
        info = pltpu.get_tpu_info()
        return int(getattr(info, "vmem_capacity_bytes", 0)) or _SMALL_VMEM
    except Exception:
        return _SMALL_VMEM


def _pick_tile(dim, target):
    """Largest lane-dense tile <= target.

    Prefers a multiple of 128 that evenly divides `dim` so *every* block is
    full (unmasked stores); otherwise the largest multiple of 128 <= target
    (only the boundary block is partial/masked).  Dims <= target are taken
    whole (always layout-legal).
    """
    if dim <= target:
        return dim
    for t in range(target, _LANE - 1, -_LANE):
        if dim % t == 0:
            return t
    return target


def _transpose2d_kernel(x_ref, o_ref):
    # x_ref: (tR, tS) tile, o_ref: (tS, tR) tile. Pure in-VMEM (XLU) transpose.
    o_ref[...] = jnp.transpose(x_ref[...], (1, 0))


def _batched_transpose_2d(x3):
    """[B, R, S] -> [B, S, R] via a tiled, lane-dense Pallas transpose."""
    B, R, S = x3.shape
    itemsize = x3.dtype.itemsize

    vmem = _chip_vmem_bytes()
    big_vmem = vmem >= 100 * _MIB        # v5e/v6e: 128 MiB; v7x: 64 MiB per TC
    # tR is the OUTPUT lane dim -> keep it large (lane-dense stores are the
    # biggest in-kernel lever).  tS only sets load width / per-step traffic, so
    # it drops to 512 on small-VMEM parts (v7x) for an asymmetric ~10-12 MiB
    # budget instead of ~20-24 MiB.
    tR = _pick_tile(R, _ROW_TILE_TARGET)
    tS = _pick_tile(S, 1024 if big_vmem else 512)
    vmem_limit = (64 if big_vmem else 48) * _MIB

    # NOTE(perf): when R < 128 (the inverse (0,2,3,1) direction, where R is the
    # channel count) the output lane dim is < 128 and stores are masked
    # vst.msk; packing multiple output rows into a >=128-lane slab would need
    # an in-kernel lane relayout.  The real fix is the BatchNorm fusion in the
    # module-level TODO.

    nR = pl.cdiv(R, tR)
    nS = pl.cdiv(S, tS)

    # Megacore: every axis is parallel; lead with the largest-extent tile axis
    # so the 2-TC split stays balanced even when B is small/odd (e.g. B=2).
    if nR >= nS:
        grid = (nR, nS, B)
        in_map = lambda i, j, b: (b, i, j)
        out_map = lambda i, j, b: (b, j, i)
    else:
        grid = (nS, nR, B)
        in_map = lambda j, i, b: (b, i, j)
        out_map = lambda j, i, b: (b, j, i)

    # If an xprof trace ever shows exposed DMA gaps at grid-step boundaries,
    # add pipeline_mode=pl.Buffered(3) to the input BlockSpec; default
    # double-buffering is kept until a trace shows that gap.
    return pl.pallas_call(
        _transpose2d_kernel,
        out_shape=jax.ShapeDtypeStruct((B, S, R), x3.dtype),
        grid=grid,
        in_specs=[pl.BlockSpec((pl.Squeezed(), tR, tS), in_map)],
        out_specs=pl.BlockSpec((pl.Squeezed(), tS, tR), out_map),
        compiler_params=pltpu.CompilerParams(
            dimension_semantics=("parallel", "parallel", "parallel"),
            vmem_limit_bytes=vmem_limit,
        ),
        cost_estimate=pl.CostEstimate(
            flops=0,
            transcendentals=0,
            bytes_accessed=2 * x3.size * itemsize,
        ),
    )(x3)


def _as_batched_2d_transpose(shape, order):
    """Detect a two-group rotation (optionally keeping dim 0 in place).

    order == (0, k..n-1, 1..k-1) -> (B, R, S) = (d0, prod d1..dk-1, prod dk..dn-1)
    order == (k..n-1, 0..k-1)    -> (1, prod d0..dk-1, prod dk..dn-1)

    Both Permute4Batchnorm directions, e.g. (0,3,1,2) and (0,2,3,1), match.
    Returns (B, R, S) or None.
    """
    n = len(order)
    if n >= 3 and order[0] == 0:
        for k in range(2, n):
            if order == (0,) + tuple(range(k, n)) + tuple(range(1, k)):
                return shape[0], math.prod(shape[1:k]), math.prod(shape[k:])
    if n >= 2:
        for k in range(1, n):
            if order == tuple(range(k, n)) + tuple(range(k)):
                return 1, math.prod(shape[:k]), math.prod(shape[k:])
    return None


def permute4batchnorm(x, order=(0, 3, 1, 2), *, min_pallas_bytes=_MIN_PALLAS_BYTES):
    """Pallas equivalent of `x.permute(*order)` (Permute4Batchnorm.forward)."""
    order = tuple(int(d) % x.ndim for d in order)
    assert len(order) == x.ndim and sorted(order) == list(range(x.ndim))
    if order == tuple(range(x.ndim)):
        return x  # identity permute

    out_shape = tuple(x.shape[d] for d in order)

    # Tiny inputs: pallas_call launch + ~0.35 us/grid-step overhead dwarfs the
    # actual data movement; let XLA's transpose (and neighbour fusion) win.
    if x.size * x.dtype.itemsize < min_pallas_bytes:
        return jnp.transpose(x, order)

    grp = _as_batched_2d_transpose(x.shape, order)
    if grp is not None:
        B, R, S = grp
        x3 = x.reshape(B, R, S)           # free: groups are contiguous in memory
        y3 = _batched_transpose_2d(x3)    # [B, S, R]
        return y3.reshape(out_shape)      # free

    # TODO(synk): non-grouped orders have no tiled single-pass Pallas path
    # here; fall back to XLA's transpose instead of DMAing a whole batch
    # element into VMEM (which exceeds scoped VMEM for production tensors).
    return jnp.transpose(x, order)


class Permute4Batchnorm:
    """Mirror of the PyTorch module: permutes dims before a BatchNorm layer."""

    def __init__(self, order):
        self.order = tuple(order)

    def __call__(self, x):
        return permute4batchnorm(x, self.order)


if __name__ == "__main__":
    key = jax.random.PRNGKey(0)
    B, T, A, C = 2, 8, 16, 32  # batch, time, agents, channels
    x = jax.random.normal(key, (B, T, A, C), dtype=jnp.float32)

    # Forward permute [B, T, A, C] -> [B, C, T, A] (channels-first for BN).
    # min_pallas_bytes=0 forces the Pallas path even at this demo size.
    order = (0, 3, 1, 2)
    y = jax.block_until_ready(permute4batchnorm(x, order, min_pallas_bytes=0))
    assert y.shape == (B, C, T, A), y.shape
    assert bool(jnp.array_equal(y, jnp.transpose(x, order))), "forward mismatch"

    # Inverse direction [B, C, T, A] -> [B, T, A, C] (back after BatchNorm).
    order_back = (0, 2, 3, 1)
    z = jax.block_until_ready(permute4batchnorm(y, order_back, min_pallas_bytes=0))
    assert bool(jnp.array_equal(z, x)), "inverse mismatch"

    # Default dispatch: this tiny input routes to XLA's transpose (same result).
    w = jax.block_until_ready(Permute4Batchnorm(order)(x))
    assert bool(jnp.array_equal(w, y)), "threshold-path mismatch"

    # Non-grouped order exercises the general (XLA) fallback.
    v = jax.block_until_ready(permute4batchnorm(x, (0, 2, 1, 3), min_pallas_bytes=0))
    assert bool(jnp.array_equal(v, jnp.transpose(x, (0, 2, 1, 3)))), "fallback mismatch"

    print("KERNEL_OK")
</pallas_src>

<mosaic_0001>
module attributes {stable_mosaic.version = 11 : i64} {
  func.func @_transpose2d_kernel(%arg0: i32, %arg1: i32, %arg2: i32, %arg3: memref<1x128x32xf32, #tpu.memory_space<vmem>>, %arg4: memref<1x32x128xf32, #tpu.memory_space<vmem>>) attributes {dimension_semantics = [#tpu.dimension_semantics<parallel>, #tpu.dimension_semantics<parallel>, #tpu.dimension_semantics<parallel>], iteration_bounds = array<i64: 1, 1, 2>, scalar_prefetch = 0 : i64, scratch_operands = 0 : i64, tpu.core_type = #tpu.core_type<tc>, window_params = [{transform_indices = @transform_0, window_bounds = array<i64: 1, 128, 32>}, {transform_indices = @transform_1, window_bounds = array<i64: 1, 32, 128>}]} {
    %c0 = arith.constant 0 : index
    %c0_0 = arith.constant 0 : index
    %c0_1 = arith.constant 0 : index
    %0 = vector.load %arg3[%c0, %c0_0, %c0_1] : memref<1x128x32xf32, #tpu.memory_space<vmem>>, vector<1x128x32xf32>
    %1 = vector.shape_cast %0 : vector<1x128x32xf32> to vector<128x32xf32>
    %2 = tpu.transpose %1, [1, 0] : vector<128x32xf32> -> vector<32x128xf32>
    %c0_2 = arith.constant 0 : index
    %c0_3 = arith.constant 0 : index
    %c0_4 = arith.constant 0 : index
    %3 = vector.load %arg4[%c0_2, %c0_3, %c0_4] : memref<1x32x128xf32, #tpu.memory_space<vmem>>, vector<1x32x128xf32>
    %4 = vector.shape_cast %3 : vector<1x32x128xf32> to vector<32x128xf32>
    %5 = vector.shape_cast %2 : vector<32x128xf32> to vector<1x32x128xf32>
    tpu.vector_store %arg4[%c0_2, %c0_3, %c0_4], %5 {strides = array<i32>} : memref<1x32x128xf32, #tpu.memory_space<vmem>>, vector<1x32x128xf32>,
    return
  }
  func.func @transform_0(%arg0: i32, %arg1: i32, %arg2: i32) -> (i32, i32, i32) {
    %c0_i32 = arith.constant 0 : i32
    return %arg2, %arg0, %arg1 : i32, i32, i32
  }
  func.func @transform_1(%arg0: i32, %arg1: i32, %arg2: i32) -> (i32, i32, i32) {
    %c0_i32 = arith.constant 0 : i32
    return %arg2, %arg1, %arg0 : i32, i32, i32
  }
}

</mosaic_0001>

<bundles_post_ra>
// kernel: tpu_custom_call.1
= control target key start
LH: loop header
LB: loop body
LE: loop exit
PB: predicated region body
PF: predicated region fallthrough
CT: control target
= control target key end

     0   :  { %6 = vsyncpa [#allocation3], 0  ;;  %s619_s0 = inlined_call_operand.vmem [shape: f32[2,128,32], index: 0, kind: input, shape index: {}]   ;;  %s620_s1 = inlined_call_operand.hbm [shape: f32[2,32,128], index: 1, kind: output, shape index: {}]  }
   0x1   :  { %8 = vsyncpa [#allocation3 + $0x1], 0  ;;  %s486_s6 = smov 0   ;;  %s488_s7 = smov 0  }
   0x2   :  { %s490_s8 = smov 0   ;;  %s492_s9 = smov 0  }
   0x3   :  { %s494_s10 = smov 0   ;;  %s496_s11 = smov 0  }
   0x4 LB: > { %s321_s12 = sadd.s32 4294967295, %s471_s11   ;;  %s322_s13 = sadd.s32 4294967294, %s471_s11   ;;  %s471_s11 = sphi %s496_s11, %s14_s11   ;;  %s467_s10 = sphi %s494_s10, %s627_s10   ;;  %s463_s9 = sphi %s492_s9, %s626_s9   ;;  %s459_s8 = sphi %s490_s8, %s625_s8   ;;  %s455_s7 = sphi %s488_s7, %s624_s7   ;;  %s451_s6 = sphi %s486_s6, %s623_s6  }
   0x5   : > { %s26_s14 = sadd.s32 1, %s467_s10  ;;  %s74_s15 = sadd.s32 1, %s459_s8 }
   0x6   : > { %p27_p0 = scmp.ge.s32.totalorder %s26_s14, 2  ;;  %p84_p1 = scmp.ne.s32.totalorder %s459_s8, %s455_s7 }
   0x7   : > { %p85_p2 = scmp.eq.s32.totalorder %s321_s12, 1  ;;  %p90_p3 = scmp.ne.s32.totalorder %s455_s7, %s451_s6 }
   0x8   : > { %s629_s14 = smov (%p27_p0, %s26_s14), 0  ;;  %p91_p5 = scmp.eq.s32.totalorder %s322_s13, 1 }
   0x9   : > { %p526_p4 = por %p85_p2, %p84_p1  ;;  %s67_s17 = ssub.s32 %s467_s10, %s629_s14 }
   0xa   : > { %p325_p6 = scmp.ge.s32.totalorder %s471_s11, 1  ;;  %p72_p7 = scmp.eq.s32.totalorder %s67_s17, 0 }
   0xb   : > { %p533_p8 = por %p91_p5, %p90_p3  ;;  %p125_p9 = scmp.lt.s32.totalorder %s471_s11, 3 }
   0xc   : > { %s539_s19 = scalar_select %p72_p7, %s459_s8, %s74_s15  }
   0xd   : > { %p126_p10 = pnand %p325_p6, %p125_p9 }
   0xe   : > { %p153_p11 = scmp.lt.s32.totalorder (!%p126_p10), %s463_s9, 1  ;;  %s149_s25 = sand.u32 (!%p126_p10), 1, %s455_s7  }
   0xf   : > { %129 = sbr.rel (%p126_p10) target bundleno = 183 (0xb7), region = 24  ;;  %s326_s26 = sshll.u32 (!%p126_p10), %s149_s25, 5 }
  0x10   : > { %s151_s27 = scalar_lea.vmem (!%p126_p10), [#allocation2], %s326_s26  ;;  %s335_s29 = sshll.u32 (!%p126_p10), %s463_s9, 9 }
  0x11   : > { %s235_s28 = sshll.u32 (!%p126_p10), %s151_s27, 4  ;;  %s571_s3 = scalar_lea.hbm (!%p126_p10), %s620_s1, %s335_s29  ;;  %s566_s28 = int_to_ptr.vmem [resolvable:$true] %s235_s28 }
  0x12   : > { %s573_s4 = scalar_lea.sflag (!%p126_p10), [#allocation3], %s149_s25  ;;  %s393_s5 = scalar_lea.vmem (!%p126_p10), %s566_s28, 512 }
  0x13   : > { %p394_p12 = scmp.ne.s32.totalorder (!%p126_p10), %s566_s28, %s393_s5 }
  0x15   : > { %p395_p13 = pnand (!%p126_p10), %p394_p12, %p526_p4 }
  0x16   : > { %s154_s20 = scalar_select %p153_p11, %s463_s9, 1 }
  0x17   : > { %p396_p0 = pneg %p395_p13  ;;  %s473_s9 = smov [#allocation2]  }
  0x18   : > { %s334_s21 = sshll.u32 %s154_s20, 7  ;;  %s397_s12 = sshll.u32 %s473_s9, 4  ;;  %s398_s12 = int_to_ptr.vmem [resolvable:$false] %s397_s12 }
  0x19   : > { %s546_s24 = scalar_lea.vmem %s619_s0, %s334_s21  ;;  %s399_s13 = scalar_lea.vmem %s398_s12, 1024 }
  0x1a   : > { %v166_v0 = vld [vmem:[%s546_s24] sm:$0xff]  ;;  %v167_v1 = vld [vmem:[%s546_s24 + $0x8] sm:$0xff]  ;;  %v168_v2 = vld [vmem:[%s546_s24 + $0x10] sm:$0xff]  ;;  %p400_p1 = scmp.lt.s32.totalorder %s566_s28, %s398_s12  ;;  %p401_p2 = scmp.lt.s32.totalorder %s399_s13, %s393_s5 }
  0x1b   : > { %182 = vxpose.xlu0.b32.start [1/16] (narrow) %v166_v0, 32  ;;  %v169_v3 = vld [vmem:[%s546_s24 + $0x18] sm:$0xff]  ;;  %v170_v4 = vld [vmem:[%s546_s24 + $0x20] sm:$0xff]  ;;  %v171_v5 = vld [vmem:[%s546_s24 + $0x28] sm:$0xff] }
  0x1c   : > { %v172_v6 = vld [vmem:[%s546_s24 + $0x30] sm:$0xff]  ;;  %v173_v7 = vld [vmem:[%s546_s24 + $0x38] sm:$0xff]  ;;  %v174_v8 = vld [vmem:[%s546_s24 + $0x40] sm:$0xff]  ;;  %p402_p3 = por %p401_p2, %p400_p1 }
  0x1d   : > { %v175_v9 = vld [vmem:[%s546_s24 + $0x48] sm:$0xff]  ;;  %v176_v10 = vld [vmem:[%s546_s24 + $0x50] sm:$0xff]  ;;  %v177_v11 = vld [vmem:[%s546_s24 + $0x58] sm:$0xff] }
  0x1e   : > { %v178_v12 = vld [vmem:[%s546_s24 + $0x60] sm:$0xff]  ;;  %v179_v13 = vld [vmem:[%s546_s24 + $0x68] sm:$0xff]  ;;  %v180_v14 = vld [vmem:[%s546_s24 + $0x70] sm:$0xff]  ;;  %p403_p5 = pnand %p402_p3, %p396_p0 }
  0x1f   : > { %183 = vxpose.xlu0.b32.cont [2/16] (narrow) %v167_v1, 32  ;;  %v181_v15 = vld [vmem:[%s546_s24 + $0x78] sm:$0xff] }
  0x23   : > { %184 = vxpose.xlu0.b32.cont [3/16] (narrow) %v168_v2, 32 }
  0x27   : > { %185 = vxpose.xlu0.b32.cont [4/16] (narrow) %v169_v3, 32 }
  0x2b   : > { %186 = vxpose.xlu0.b32.cont [5/16] (narrow) %v170_v4, 32 }
  0x2f   : > { %187 = vxpose.xlu0.b32.cont [6/16] (narrow) %v171_v5, 32 }
  0x33   : > { %188 = vxpose.xlu0.b32.cont [7/16] (narrow) %v172_v6, 32 }
  0x37   : > { %189 = vxpose.xlu0.b32.cont [8/16] (narrow) %v173_v7, 32 }
  0x3b   : > { %190 = vxpose.xlu0.b32.cont [9/16] (narrow) %v174_v8, 32 }
  0x3f   : > { %191 = vxpose.xlu0.b32.cont [10/16] (narrow) %v175_v9, 32 }
  0x43   : > { %192 = vxpose.xlu0.b32.cont [11/16] (narrow) %v176_v10, 32 }
  0x47   : > { %193 = vxpose.xlu0.b32.cont [12/16] (narrow) %v177_v11, 32 }
  0x4b   : > { %194 = vxpose.xlu0.b32.cont [13/16] (narrow) %v178_v12, 32 }
  0x4f   : > { %195 = vxpose.xlu0.b32.cont [14/16] (narrow) %v179_v13, 32 }
  0x53   : > { %196 = vxpose.xlu0.b32.cont [15/16] (narrow) %v180_v14, 32 }
  0x57   : > { %197 = vxpose.xlu0.b32.end [16/16] (narrow) %v181_v15, 32 }
  0x9b   : > { %v198_v16 = vpop.trf.xlu0 }
  0x9c   : > { %214 = vst [vmem:[%s151_s27] sm:$0xff] %v198_v16 }
  0x9f   : > { %v199_v17 = vpop.trf.xlu0 }
  0xa0   : > { %215 = vst [vmem:[%s151_s27 + $0x8] sm:$0xff] %v199_v17 }
  0xa3   : > { %v200_v18 = vpop.trf.xlu0 }
  0xa4   : > { %216 = vst [vmem:[%s151_s27 + $0x10] sm:$0xff] %v200_v18 }
  0xa7   : > { %v201_v19 = vpop.trf.xlu0 }
  0xa8   : > { %217 = vst [vmem:[%s151_s27 + $0x18] sm:$0xff] %v201_v19 }
  0xa9   : > { %406 = shalt.err (!%p403_p5)
}
  0xaa   : > { %s407_s15 = scalar_lea.hbm %s571_s3, 512  ;;  %s411_s21 = scalar_lea.hbm %s620_s1, 1024 }
  0xab   : > { %p408_p6 = scmp.ne.s32.totalorder %s571_s3, %s407_s15  ;;  %p412_p10 = scmp.lt.u32.totalorder %s571_s3, %s620_s1 }
  0xac   : > { %p413_p11 = scmp.lt.u32.totalorder %s411_s21, %s407_s15  ;;  %p415_p13 = scmp.lt.u32.totalorder %s407_s15, %s571_s3 }
  0xad   : > { %p409_p7 = pnand %p408_p6, %p526_p4 }
  0xae   : > { %p414_p12 = por %p413_p11, %p412_p10 }
  0xaf   : > { %p410_p9 = pneg %p409_p7 }
  0xb0   : > { %p416_p0 = por %p415_p13, %p414_p12 }
  0xb2   : > { %p417_p1 = pnand %p416_p0, %p410_p9 }
  0xb4   : > { %420 = shalt.err (!%p417_p1)
}
  0xb5   : > { %s474_s24 = smov 128   ;;  %s475_s25 = smov 8  }
  0xb6   : > { %336 = dma.vmem_to_hbm [thread:$0]  (%p526_p4), %s566_s28, 512, %s571_s3, %s573_s4, %s474_s24, %s474_s24, %s475_s25  }
  0xb7 PF: > { %p342_p2 = scmp.ge.s32.totalorder %s471_s11, 2  ;;  %s250_s26 = sand.u32 1, %s451_s6  }
  0xb8   : > { %s251_s27 = scalar_lea.sflag [#allocation3], %s250_s26 }
  0xb9   : > { %p339_p3 = pnand %p342_p2, %p533_p8 }
  0xbb   : > { %446 = dma.done.wait (!%p339_p3), %s251_s27, 512  }
  0xbc   : > { %448 = vsyncadd (!%p339_p3), %s251_s27, 4294966784  ;;  %s14_s11 = sadd.s32 1, %s471_s11   ;;  %s623_s6 = smov %s455_s7 }
  0xbd   : > { %p11_p5 = scmp.ge.s32.totalorder %s14_s11, 4   ;;  %s624_s7 = smov %s459_s8 }
  0xbe   : > { %s625_s8 = smov %s539_s19  ;;  %s626_s9 = smov %s467_s10 }
  0xbf   : > { %s627_s10 = smov %s629_s14  ;;  %13 = sbr.rel (!%p11_p5) target bundleno = 4 (0x4), region = 59 }
  0xc6   :  { %256 = vsyncpa [#allocation3], 1 }
  0xc7   :  { %258 = vsyncpa [#allocation3 + $0x1], 1 }

</bundles_post_ra>
